<compile_context>
chip_gen: v5e
topology: v5e:2x2
jax: 0.10.0
libtpu: 0.0.40
codegen_flags: <defaults>
</compile_context>

<pallas_src>
import functools

import jax
import jax.numpy as jnp
from jax import lax
from jax.experimental import pallas as pl
from jax.experimental.pallas import tpu as pltpu

CONTEXT_SIZE = 256  # matches module; only T <= CONTEXT_SIZE rows are ever used
LANE = 128          # TPU vreg lane width


def _head_kernel(x_ref, w_ref, o_ref, *, h_pad, exp_dtype):
    # x_ref: (B_tile, T, C)      native input dtype (f32), cast in VMEM
    # w_ref: (C, 3*Hp)           fused, zero-padded [K | Q*scale | V] weights (bf16)
    # o_ref: (B_tile, T, Hp)     compute-dtype output (extra Hp-H columns are zero)
    bt, t, c = x_ref.shape
    cdt = w_ref.dtype  # compute dtype for MXU operands (bf16)

    # ---- fused QKV projection: one (bt*T, C) x (C, 3*Hp) MXU matmul ----
    x2d = x_ref[...].astype(cdt).reshape(bt * t, c)
    qkv = jnp.dot(x2d, w_ref[...], preferred_element_type=jnp.float32)
    qkv = qkv.reshape(bt, t, 3 * h_pad).astype(cdt)
    k = qkv[:, :, 0 * h_pad:1 * h_pad]        # (bt, T, Hp), lane-aligned slices
    q = qkv[:, :, 1 * h_pad:2 * h_pad]        # scale already folded into w_query
    v = qkv[:, :, 2 * h_pad:3 * h_pad]

    # ---- scores: contraction over head dim, no explicit k.T materialization ----
    # (zero-padded head columns contribute exactly 0 to the dot product)
    wei = jnp.einsum('bqd,bkd->bqk', q, k,
                     preferred_element_type=jnp.float32)           # (bt, T, T) f32

    # ---- causal mask: single 2D (T,T) compare, broadcast over the batch tile ----
    row = lax.broadcasted_iota(jnp.int32, (t, t), 0)
    col = lax.broadcasted_iota(jnp.int32, (t, t), 1)
    mask = (col <= row)[None, :, :]
    # large finite negative instead of -inf: identical result (exp underflows to 0
    # since the diagonal is always unmasked) but never produces NaN.
    wei = jnp.where(mask, wei, jnp.float32(-1e30))

    # ---- softmax, normalization deferred past attn @ v ----
    m = jnp.max(wei, axis=-1, keepdims=True)                       # f32
    p = jnp.exp((wei - m).astype(exp_dtype))                       # bf16 exp on v6e/v7x
    denom = jnp.sum(p.astype(jnp.float32), axis=-1, keepdims=True)  # (bt, T, 1) f32

    # dropout: identity (eval mode)

    out = jnp.einsum('bqk,bkd->bqd', p.astype(cdt), v,
                     preferred_element_type=jnp.float32)           # (bt, T, Hp) f32
    out = out * pl.reciprocal(denom, approx=True)                  # EUP recip, T*Hp muls
    o_ref[...] = out.astype(o_ref.dtype)


def _default_exp_dtype():
    """bf16 exponentials only where the EUP supports bf16 (v6e / v7x)."""
    try:
        kind = jax.devices()[0].device_kind.lower()
    except Exception:
        return jnp.float32
    if "v6" in kind or "v7" in kind:
        return jnp.bfloat16
    return jnp.float32


def _vmem_estimate(bt, t, c, h_pad, x_itemsize):
    """Rough per-step VMEM bytes: double-buffered I/O blocks + live intermediates."""
    io = (2 * bt * t * c * x_itemsize          # x block (double buffered)
          + 2 * c * 3 * h_pad * 2              # fused weight (bf16)
          + 2 * bt * t * h_pad * 2)            # output block (bf16)
    inter = (bt * t * 3 * h_pad * (4 + 2)      # qkv f32 + bf16 copies
             + bt * t * t * (4 + 4)            # scores + exp probabilities
             + bt * t * h_pad * 4              # f32 out accumulator
             + t * t * 4)                      # 2D mask / iota
    return io + inter


def _pick_batch_tile(B, t, c, h_pad, x_itemsize, budget=24 * 1024 * 1024):
    """Largest divisor of B (<= 8) that fits the VMEM budget, preferring an even
    grid extent (>= 2) so both v7x TensorCores get balanced work."""
    divisors = [d for d in range(1, min(8, B) + 1) if B % d == 0]
    fitting = [d for d in divisors
               if _vmem_estimate(d, t, c, h_pad, x_itemsize) <= budget]
    cands = fitting if fitting else [1]
    return max(cands, key=lambda d: (((B // d) % 2 == 0) and (B // d) >= 2, d))


def head_forward(x, w_key, w_query, w_value, *, batch_tile=None,
                 compute_dtype=jnp.bfloat16, exp_dtype=None):
    """x: (B, T, C) float32; w_*: (C, H) float32 (pre-transposed Linear weights)."""
    B, T, C = x.shape
    H = w_key.shape[1]
    Hp = ((H + LANE - 1) // LANE) * LANE      # lane-dense padded head size

    if exp_dtype is None:
        exp_dtype = _default_exp_dtype()

    # Fused + zero-padded QKV weight: (C, 3*Hp).  The head_size**-0.5 scale is
    # folded into the query columns (uses the TRUE head size), so the kernel
    # never multiplies the (bt,T,T) score tensor by a scalar.
    scale = float(H) ** -0.5

    def _pad(w):
        return jnp.pad(w, ((0, 0), (0, Hp - H)))

    w_qkv = jnp.concatenate(
        [_pad(w_key), _pad(w_query * scale), _pad(w_value)], axis=1
    ).astype(compute_dtype)

    # Batch tiling: divisor of B (no wrapper-side padding pass), even grid when
    # possible, VMEM-budget-capped tile size.
    if batch_tile is None:
        batch_tile = _pick_batch_tile(B, T, C, Hp, x.dtype.itemsize)
    assert B % batch_tile == 0, "batch_tile must divide B"
    grid_b = B // batch_tile

    vmem_est = _vmem_estimate(batch_tile, T, C, Hp, x.dtype.itemsize)
    vmem_limit = int(min(48 * 1024 * 1024, max(32 * 1024 * 1024, 2 * vmem_est)))

    kernel = functools.partial(_head_kernel, h_pad=Hp, exp_dtype=exp_dtype)

    out = pl.pallas_call(
        kernel,
        out_shape=jax.ShapeDtypeStruct((B, T, Hp), compute_dtype),
        grid_spec=pltpu.PrefetchScalarGridSpec(
            num_scalar_prefetch=0,
            grid=(grid_b,),
            in_specs=[
                pl.BlockSpec((batch_tile, T, C), lambda b: (b, 0, 0)),
                pl.BlockSpec((C, 3 * Hp), lambda b: (0, 0)),
            ],
            out_specs=pl.BlockSpec((batch_tile, T, Hp), lambda b: (b, 0, 0)),
        ),
        compiler_params=pltpu.CompilerParams(
            dimension_semantics=("parallel",),
            vmem_limit_bytes=vmem_limit,
        ),
    )(x, w_qkv)

    # Slice back to the true head size; the f32 upcast is fused into this pass.
    return out[:, :, :H].astype(x.dtype)


def reference_forward(x, w_key, w_query, w_value):
    """Pure-JAX f32 reference mirroring the PyTorch forward (eval mode)."""
    B, T, C = x.shape
    H = w_key.shape[1]
    k = x @ w_key
    q = x @ w_query
    v = x @ w_value
    wei = (q @ jnp.swapaxes(k, 1, 2)) * (H ** -0.5)
    tril = jnp.tril(jnp.ones((T, T), dtype=bool))
    wei = jnp.where(tril[None, :, :], wei, -jnp.inf)
    wei = jax.nn.softmax(wei, axis=-1)
    return wei @ v


if __name__ == "__main__":
    # Small, module-consistent shapes
    B, T, C, H = 2, 8, 32, 16   # batch, seq, embed_dim, head_size
    assert T <= CONTEXT_SIZE

    key = jax.random.PRNGKey(0)
    kx, kk, kq, kv = jax.random.split(key, 4)

    x = jax.random.normal(kx, (B, T, C), dtype=jnp.float32)
    # deterministic "Linear" weights, stored already transposed to (C, H)
    bound = 1.0 / (C ** 0.5)
    w_key = jax.random.uniform(kk, (C, H), jnp.float32, -bound, bound)
    w_query = jax.random.uniform(kq, (C, H), jnp.float32, -bound, bound)
    w_value = jax.random.uniform(kv, (C, H), jnp.float32, -bound, bound)

    out = head_forward(x, w_key, w_query, w_value)
    out = jax.block_until_ready(out)

    ref = reference_forward(x, w_key=w_key, w_query=w_query, w_value=w_value)
    assert out.shape == (B, T, H)
    # bf16 matmul operands / exp / output store + approx reciprocal -> loose tolerance
    assert jnp.allclose(out, ref, atol=5e-2, rtol=5e-2), "mismatch vs reference"

    print("KERNEL_OK")
</pallas_src>

<mosaic_0001>
module attributes {stable_mosaic.version = 11 : i64} {
  func.func @_head_kernel(%arg0: i32, %arg1: memref<1x8x32xf32, #tpu.memory_space<vmem>>, %arg2: memref<32x384xbf16, #tpu.memory_space<vmem>>, %arg3: memref<1x8x128xbf16, #tpu.memory_space<vmem>>) attributes {dimension_semantics = [#tpu.dimension_semantics<parallel>], iteration_bounds = array<i64: 2>, scalar_prefetch = 0 : i64, scratch_operands = 0 : i64, tpu.core_type = #tpu.core_type<tc>, window_params = [{transform_indices = @transform_0, window_bounds = array<i64: 1, 8, 32>}, {pipeline_mode = #tpu.pipeline_mode<synchronous>, transform_indices = @transform_1, window_bounds = array<i64: 32, 384>}, {transform_indices = @transform_2, window_bounds = array<i64: 1, 8, 128>}]} {
    %c0 = arith.constant 0 : index
    %c0_0 = arith.constant 0 : index
    %c0_1 = arith.constant 0 : index
    %0 = vector.load %arg1[%c0, %c0_0, %c0_1] : memref<1x8x32xf32, #tpu.memory_space<vmem>>, vector<1x8x32xf32>
    %1 = arith.truncf %0 : vector<1x8x32xf32> to vector<1x8x32xbf16>
    %2 = vector.shape_cast %1 : vector<1x8x32xbf16> to vector<8x32xbf16>
    %c0_2 = arith.constant 0 : index
    %c0_3 = arith.constant 0 : index
    %3 = vector.load %arg2[%c0_2, %c0_3] : memref<32x384xbf16, #tpu.memory_space<vmem>>, vector<32x384xbf16>
    %cst = arith.constant dense<0.000000e+00> : vector<8x384xf32>
    %4 = tpu.matmul %2, %3, %cst {dimension_numbers = #tpu.dot_dimension_numbers<[1], [0], [0], [1], [0, 0, 1, 1], [], []>} : vector<8x32xbf16>, vector<32x384xbf16>, vector<8x384xf32> -> vector<8x384xf32>
    %5 = vector.shape_cast %4 : vector<8x384xf32> to vector<1x8x384xf32>
    %6 = arith.truncf %5 : vector<1x8x384xf32> to vector<1x8x384xbf16>
    %7 = vector.extract_strided_slice %6 {offsets = [0, 0, 0], sizes = [1, 8, 128], strides = [1, 1, 1]} : vector<1x8x384xbf16> to vector<1x8x128xbf16>
    %8 = vector.extract_strided_slice %6 {offsets = [0, 0, 128], sizes = [1, 8, 128], strides = [1, 1, 1]} : vector<1x8x384xbf16> to vector<1x8x128xbf16>
    %9 = vector.extract_strided_slice %6 {offsets = [0, 0, 256], sizes = [1, 8, 128], strides = [1, 1, 1]} : vector<1x8x384xbf16> to vector<1x8x128xbf16>
    "tpu.trace_start"() <{level = 10 : i32, message = "bqd,bkd->bqk"}> : () -> ()
    %cst_4 = arith.constant dense<0.000000e+00> : vector<1x8x8xf32>
    %10 = tpu.matmul %8, %7, %cst_4 {dimension_numbers = #tpu.dot_dimension_numbers<[2], [2], [1], [1], [0, 0, 0, 1, 1, 1], [0], [0]>} : vector<1x8x128xbf16>, vector<1x8x128xbf16>, vector<1x8x8xf32> -> vector<1x8x8xf32>
    "tpu.trace_stop"() : () -> ()
    %11 = tpu.iota {dimensions = array<i32: 0>} : vector<8x8xi32>
    %12 = tpu.iota {dimensions = array<i32: 1>} : vector<8x8xi32>
    %13 = arith.cmpi sle, %12, %11 : vector<8x8xi32>
    %14 = vector.shape_cast %13 : vector<8x8xi1> to vector<1x8x8xi1>
    %cst_5 = arith.constant -1.000000e+30 : f32
    %15 = vector.broadcast %cst_5 : f32 to vector<1x8x8xf32>
    %16 = arith.select %14, %10, %15 : vector<1x8x8xi1>, vector<1x8x8xf32>
    %cst_6 = arith.constant dense<0xFF800000> : vector<1x8xf32>
    %17 = vector.multi_reduction <maximumf>, %16, %cst_6 [2] : vector<1x8x8xf32> to vector<1x8xf32>
    %18 = vector.shape_cast %17 : vector<1x8xf32> to vector<1x8x1xf32>
    %19 = vector.broadcast %18 : vector<1x8x1xf32> to vector<1x8x8xf32>
    %20 = arith.subf %16, %19 : vector<1x8x8xf32>
    %21 = math.exp %20 : vector<1x8x8xf32>
    %cst_7 = arith.constant dense<0.000000e+00> : vector<1x8xf32>
    %22 = vector.multi_reduction <add>, %21, %cst_7 [2] : vector<1x8x8xf32> to vector<1x8xf32>
    %23 = vector.shape_cast %22 : vector<1x8xf32> to vector<1x8x1xf32>
    %24 = arith.truncf %21 : vector<1x8x8xf32> to vector<1x8x8xbf16>
    "tpu.trace_start"() <{level = 10 : i32, message = "bqk,bkd->bqd"}> : () -> ()
    %cst_8 = arith.constant dense<0.000000e+00> : vector<1x8x128xf32>
    %25 = tpu.matmul %24, %9, %cst_8 {dimension_numbers = #tpu.dot_dimension_numbers<[2], [1], [1], [2], [0, 0, 0, 1, 1, 2], [0], [0]>} : vector<1x8x8xbf16>, vector<1x8x128xbf16>, vector<1x8x128xf32> -> vector<1x8x128xf32>
    "tpu.trace_stop"() : () -> ()
    %26 = tpu.reciprocal %23 {approx = true} : vector<1x8x1xf32> -> vector<1x8x1xf32>
    %27 = vector.broadcast %26 : vector<1x8x1xf32> to vector<1x8x128xf32>
    %28 = arith.mulf %25, %27 : vector<1x8x128xf32>
    %29 = arith.truncf %28 : vector<1x8x128xf32> to vector<1x8x128xbf16>
    %c0_9 = arith.constant 0 : index
    %c0_10 = arith.constant 0 : index
    %c0_11 = arith.constant 0 : index
    %30 = vector.load %arg3[%c0_9, %c0_10, %c0_11] : memref<1x8x128xbf16, #tpu.memory_space<vmem>>, vector<1x8x128xbf16>
    tpu.vector_store %arg3[%c0_9, %c0_10, %c0_11], %29 {strides = array<i32>} : memref<1x8x128xbf16, #tpu.memory_space<vmem>>, vector<1x8x128xbf16>,
    return
  }
  func.func @transform_0(%arg0: i32) -> (i32, i32, i32) {
    %c0_i32 = arith.constant 0 : i32
    %c0_i32_0 = arith.constant 0 : i32
    %c0_i32_1 = arith.constant 0 : i32
    return %arg0, %c0_i32, %c0_i32_0 : i32, i32, i32
  }
  func.func @transform_1(%arg0: i32) -> (i32, i32) {
    %c0_i32 = arith.constant 0 : i32
    %c0_i32_0 = arith.constant 0 : i32
    %c0_i32_1 = arith.constant 0 : i32
    return %c0_i32, %c0_i32_0 : i32, i32
  }
  func.func @transform_2(%arg0: i32) -> (i32, i32, i32) {
    %c0_i32 = arith.constant 0 : i32
    %c0_i32_0 = arith.constant 0 : i32
    %c0_i32_1 = arith.constant 0 : i32
    return %arg0, %c0_i32, %c0_i32_0 : i32, i32, i32
  }
}

</mosaic_0001>

<bundles_post_ra>
// kernel: tpu_custom_call.1
= control target key start
LH: loop header
LB: loop body
LE: loop exit
PB: predicated region body
PF: predicated region fallthrough
CT: control target
= control target key end

     0   :  { %7 = vsyncpa [#allocation3], 0  ;;  %s817_s0 = inlined_call_operand.hbm [shape: f32[2,8,32], index: 0, kind: input, shape index: {}]   ;;  %s818_s1 = inlined_call_operand.hbm [shape: bf16[32,384], index: 1, kind: input, shape index: {}]   ;;  %s819_s2 = inlined_call_operand.hbm [shape: bf16[2,8,128], index: 2, kind: output, shape index: {}]  }
   0x1   :  { %9 = vsyncpa [#allocation3 + $0x1], 0 }
   0x2   :  { %10 = vsyncpa [#allocation6], 0 }
   0x3   :  { %11 = vsyncpa [#allocation4], 0 }
   0x4   :  { %13 = vsyncpa [#allocation4 + $0x1], 0  ;;  %s680_s9 = smov 0   ;;  %s682_s10 = smov 0  }
   0x5   :  { %s684_s11 = smov 0   ;;  %s686_s12 = smov 0  }
   0x6 LB: > { %s108_s15 = sshll.u32 %s818_s1, 4  ;;  %s704_s16 = sadd.s32 4294967295, %s660_s12   ;;  %s660_s12 = sphi %s686_s12, %s829_s12   ;;  %s656_s11 = sphi %s684_s11, %s828_s11   ;;  %s652_s10 = sphi %s682_s10, %s827_s10   ;;  %s648_s9 = sphi %s680_s9, %s826_s9   ;;  %s109_s15 = int_to_ptr.hbm [resolvable:$true] %s108_s15 }
   0x7   : > { %p420_p0 = scmp.ge.s32.totalorder %s660_s12, 1  ;;  %p40_p1 = scmp.eq.s32.totalorder %s704_s16, 0 }
   0x8   : > { %p97_p2 = scmp.lt.s32.totalorder %s660_s12, 3  ;;  %s662_s18 = smov [#allocation5]  }
   0x9   : > { %s110_s19 = sshll.u32 %s662_s18, 4  ;;  %s663_s20 = smov 192   ;;  %s111_s19 = int_to_ptr.vmem [resolvable:$true] %s110_s19 }
   0xa   : > { %p709_p3 = pnand %p420_p0, %p97_p2  ;;  %s664_s21 = smov 12  }
   0xb   : > { %s419_s22 = sadd.s32 4294967294, %s660_s12   ;;  %s720_s23 = sadd.s32 1, %s660_s12  }
   0xc   : > { %p475_p4 = pneg %p709_p3  ;;  %s26_s24 = sadd.s32 1, %s656_s11 }
   0xd   : > { %s23_s25 = ssub.s32 %s660_s12, %s720_s23  ;;  %p33_p7 = scmp.ne.s32.totalorder %s656_s11, %s652_s10 }
   0xe   : > { %p476_p6 = pnand %p475_p4, %p40_p1  ;;  %p24_p8 = scmp.eq.s32.totalorder %s23_s25, 0 }
   0xf   : > { %p34_p9 = scmp.eq.s32.totalorder %s660_s12, 0  ;;  %p39_p10 = scmp.ne.s32.totalorder %s652_s10, %s648_s9 }
  0x10   : > { %478 = dma.hbm_to_vmem [thread:$0]  (!%p476_p6), %s109_s15, 768, %s111_s19, [#allocation6], %s663_s20, %s663_s20, %s664_s21  }
  0x11   : > { %p84_p11 = scmp.eq.s32.totalorder %s704_s16, 1  ;;  %p736_p12 = por %p40_p1, %p39_p10 }
  0x12   : > { %s732_s26 = scalar_select %p24_p8, %s656_s11, %s26_s24  }
  0x13   : > { %p740_p13 = por %p84_p11, %p33_p7  ;;  %p90_p0 = scmp.eq.s32.totalorder %s419_s22, 1 }
  0x14   : > { %p35_p2 = por %p34_p9, %p33_p7  ;;  %s124_s29 = sand.u32 1, %s656_s11  }
  0x15   : > { %p745_p4 = por %p90_p0, %p39_p10  ;;  %p488_p6 = scmp.lt.s32.totalorder %s660_s12, 2 }
  0x16   : > { %s423_s3 = sshll.u32 %s124_s29, 3  ;;  %s424_s4 = sshll.u32 %s660_s12, 3 }
  0x17   : > { %s132_s7 = scalar_lea.hbm %s817_s0, %s424_s4  ;;  %s128_s13 = scalar_lea.vmem [#allocation2], %s423_s3 }
  0x18   : > { %s134_s8 = sshll.u32 %s132_s7, 4  ;;  %s136_s14 = sshll.u32 %s128_s13, 4  ;;  %s135_s8 = int_to_ptr.hbm [resolvable:$true] %s134_s8  ;;  %s137_s14 = int_to_ptr.vmem [resolvable:$true] %s136_s14 }
  0x19   : > { %p754_p8 = pnand %p488_p6, %p35_p2  ;;  %s125_s18 = scalar_lea.sflag [#allocation3], %s124_s29 }
  0x1a   : > { %s560_s19 = sshra.s32 %s135_s8, 4  ;;  %s567_s24 = scalar_lea.hbm %s817_s0, 16  ;;  %s561_s19 = int_to_ptr.hbm [resolvable:$true] %s560_s19 }
  0x1b   : > { %s562_s20 = scalar_lea.hbm %s561_s19, 8  ;;  %p564_p9 = pneg %p754_p8 }
  0x1c   : > { %p563_p7 = scmp.ne.s32.totalorder %s561_s19, %s562_s20  ;;  %p568_p0 = scmp.lt.s32.totalorder %s561_s19, %s817_s0 }
  0x1d   : > { %p569_p2 = scmp.lt.s32.totalorder %s567_s24, %s562_s20 }
  0x1e   : > { %p565_p10 = pnand %p564_p9, %p563_p7 }
  0x1f   : > { %p570_p6 = por %p569_p2, %p568_p0 }
  0x20   : > { %p566_p11 = pneg %p565_p10 }
  0x22   : > { %p571_p5 = pnand %p570_p6, %p566_p11 }
  0x24   : > { %574 = shalt.err (!%p571_p5)
}
  0x25   : > { %482 = dma.hbm_to_vmem [thread:$0]  (!%p754_p8), %s135_s8, 128, %s137_s14, %s125_s18  }
  0x26   : > { %145 = sbr.rel (%p709_p3) target bundleno = 589 (0x24d), region = 28  ;;  %s771_s29 = sand.u32 (!%p709_p3), 1, %s652_s10  }
  0x27   : > { %s426_s4 = sshll.u32 (!%p709_p3), %s771_s29, 3  ;;  %s148_s5 = scalar_lea.sflag (!%p709_p3), [#allocation3], %s771_s29 }
  0x28   : > { %s151_s6 = scalar_lea.vmem (!%p709_p3), [#allocation2], %s426_s4 }
  0x2b   : > { %635 = dma.done.wait (%p736_p12), %s148_s5, 128  }
  0x2c   : > { %637 = vsyncadd (%p736_p12), %s148_s5, 4294967168 }
  0x2d   : > { %639 = dma.done.wait (%p40_p1), [#allocation6], 768  }
  0x2e   : > { %641 = vsyncadd (%p40_p1), [#allocation6], 4294966528  ;;  %v443_v0 = vld [vmem:[#allocation5 + $0x18] sm:$0xf]  ;;  %v465_v1 = vld [vmem:[#allocation5 + $0x20] sm:$0xf0]  ;;  %v282_v30 = vlaneseq }
  0x2f   : > { %v464_v2 = vld [vmem:[#allocation5 + $0x1c] sm:$0xf]  ;;  %v444_v3 = vor.u32 %v465_v1, %v443_v0  ;;  %v445_v4 = vld [vmem:[#allocation5 + $0x24] sm:$0xf0]  ;;  %v431_v5 = vld [vmem:[#allocation5] sm:$0xf] }
  0x30   : > { %v462_v6 = vld [vmem:[#allocation5 + $0x8] sm:$0xf0]  ;;  %v448_v7 = vor.u32 %v464_v2, %v445_v4  ;;  %v461_v8 = vld [vmem:[#allocation5 + $0x4] sm:$0xf]  ;;  %v433_v9 = vld [vmem:[#allocation5 + $0xc] sm:$0xf0] }
  0x31   : > { %231 = vmatpush.bf16.msra.mxu0 %v444_v3  ;;  %v432_v10 = vor.u32 %v462_v6, %v431_v5  ;;  %v179_v11 = vld [vmem:[%s151_s6] sm:$0xff]  ;;  %v436_v12 = vor.u32 %v461_v8, %v433_v9  ;;  %vm221_vm0 = vcmask 261120   ;;  %v451_v14 = vld [vmem:[#allocation5 + $0x20] sm:$0xf]  ;;  %v466_v15 = vld [vmem:[#allocation5 + $0x28] sm:$0xf0] }
  0x32   : > { %244 = vmatpush.bf16.msra.mxu1 %v448_v7  ;;  %v180_v13 = vpack.c.bf16 %v179_v11, %v179_v11  ;;  %v439_v16 = vld [vmem:[#allocation5 + $0x8] sm:$0xf]  ;;  %v452_v17 = vor.u32 %v466_v15, %v451_v14  ;;  %v463_v18 = vld [vmem:[#allocation5 + $0x10] sm:$0xf0]  ;;  %vm302_vm1 = vcmask 1043456   ;;  %v283_v31 = vshrl.u32 %v282_v30, 7 }
  0x33   : > { %v440_v19 = vor.u32 %v463_v18, %v439_v16  ;;  %v285_v32 = vand.u32 127, %v282_v30  ;;  %vm288_vm3 = vcmask 64512   ;;  %s428_s17 = sshll.u32 %s771_s29, 2  ;;  %s458_s27 = sshll.u32 %s704_s16, 2 }
  0x34   : > { %257 = vmatpush.bf16.msra.mxu2 %v452_v17  ;;  %s334_s13 = scalar_lea.hbm %s819_s2, %s458_s27  ;;  %s177_s14 = scalar_lea.vmem [#allocation7], %s428_s17 }
  0x35   : > { %232 = vmatpush.bf16.msra.mxu0 %v432_v10  ;;  %vm286_vm2 = vcmp.le.s32.totalorder %v285_v32, %v283_v31  ;;  %s336_s15 = sshll.u32 %s177_s14, 4  ;;  %s338_s18 = sshll.u32 %s334_s13, 4  ;;  %s337_s15 = int_to_ptr.vmem [resolvable:$true] %s336_s15  ;;  %s339_s18 = int_to_ptr.hbm [resolvable:$true] %s338_s18 }
  0x36   : > { %245 = vmatpush.bf16.msra.mxu1 %v436_v12  ;;  %s324_s19 = scalar_lea.sflag [#allocation4], %s771_s29  ;;  %s604_s20 = sshra.s32 %s339_s18, 4  ;;  %s605_s20 = int_to_ptr.hbm [resolvable:$true] %s604_s20 }
  0x37   : > { %s606_s21 = scalar_lea.hbm %s605_s20, 4  ;;  %s610_s24 = scalar_lea.hbm %s819_s2, 8 }
  0x38   : > { %453 = vmatmul.msk.bf16.vlgmr.msra.gmra.mxu0 %vm221_vm0, %v180_v13  ;;  %258 = vmatpush.bf16.msra.mxu2 %v440_v19  ;;  %p607_p1 = scmp.ne.s32.totalorder %s605_s20, %s606_s21  ;;  %p611_p12 = scmp.lt.s32.totalorder %s605_s20, %s819_s2 }
  0x39   : > { %454 = vmatmul.msk.bf16.vlgmr.msra.gmra.mxu1 %vm221_vm0, %v180_v13  ;;  %p612_p8 = scmp.lt.s32.totalorder %s610_s24, %s606_s21 }
  0x3a   : > { %p608_p3 = pnand %p607_p1, %p740_p13 }
  0x3b   : > { %455 = vmatmul.msk.bf16.vlgmr.msra.gmra.mxu2 %vm221_vm0, %v180_v13  ;;  %p613_p7 = por %p612_p8, %p611_p12 }
  0x3c   : > { %p609_p5 = pneg %p608_p3 }
  0x3e   : > { %p614_p9 = pnand %p613_p7, %p609_p5 }
  0xb5   : > { %v234_v20 = vpop.f32.mrf.mxu0 }
  0xb6   : > { %v247_v21 = vpop.f32.mrf.mxu1 }
  0xb7   : > { %v264_v22 = vpack.c.bf16 %v247_v21, %v234_v20 }
  0xb9   : > { %276 = vmatpush.bf16.xpose.msra.mxu3 %v264_v22  ;;  %v267_v25 = vrot.slane %v264_v22, 4 }
  0xbd   : > { %v236_v23 = vpop.f32.mrf.mxu0 }
  0xbe   : > { %v249_v24 = vpop.f32.mrf.mxu1  ;;  %v260_v26 = vpop.f32.mrf.mxu2 }
  0xbf   : > { %v265_v27 = vpack.c.bf16 %v260_v26, %v260_v26 }
  0xc0   : > { %277 = vmatmul.bf16.vlgmr.msra.gmra.mxu3 %v267_v25 }
  0xc1   : > { %v304_v28 = vsel %vm302_vm1, %v265_v27, 0 }
  0xc2   : > { %313 = vmatpush.bf16.msrb.mxu0 %v304_v28 }
  0xc6   : > { %v262_v29 = vpop.f32.mrf.mxu2 }
 0x143   : > { %v278_v33 = vpop.f32.mrf.mxu3 }
 0x144   : > { %v287_v34 = vsel %vm286_vm2, %v278_v33, -1e+30 }
 0x145   : > { %v289_v35 = vsel %vm288_vm3, %v287_v34, -inf }
 0x146   : > { %290 = vmax.xlane.f32.xlu0 %v289_v35 }
 0x14b   : > { %v280_v36 = vpop.f32.mrf.mxu3 }
 0x1b9   : > { %v291_v37 = vpop.xlane.xlu0 %290 }
 0x1ba   : > { %v292_v38 = vsub.f32 %v287_v34, %v291_v37 }
 0x1bc   : > { %v293_v39 = vmul.f32 1.442695, %v292_v38 }
 0x1be   : > { %526 = vpow2.f32 %v293_v39 }
 0x1c4   : > { %v527_v40 = vpop.eup %526 }
 0x1c5   : > { %v295_v41 = vsel %vm288_vm3, %v527_v40, 0.0  ;;  %v298_v42 = vpack.c.bf16 %v527_v40, %v527_v40 }
 0x1c6   : > { %296 = vadd.xlane.f32.xlu0 %v295_v41 }
 0x1c7   : > { %456 = vmatmul.msk.bf16.vlgmr.msrb.gmra.mxu0 %vm288_vm3, %v298_v42 }
 0x239   : > { %v297_v43 = vpop.xlane.xlu0 %296 }
 0x23a   : > { %528 = vrcp.f32 %v297_v43 }
 0x240   : > { %v529_v44 = vpop.eup %528 }
 0x244   : > { %v315_v45 = vpop.f32.mrf.mxu0 }
 0x245   : > { %v320_v46 = vmul.f32 %v529_v44, %v315_v45 }
 0x247   : > { %v321_v47 = vpack.c.bf16 %v320_v46, %v320_v46 }
 0x249   : > { %322 = vst [vmem:[%s177_s14] sm:$0xf] %v321_v47 }
 0x24a   : > { %617 = shalt.err (!%p614_p9)
}
 0x24b   : > { %473 = dma.vmem_to_hbm [thread:$0]  (%p740_p13), %s337_s15, 64, %s339_s18, %s324_s19  }
 0x24c   : > { %v317_v48 = vpop.f32.mrf.mxu0 }
 0x24d PF: > { %s350_s29 = sand.u32 1, %s648_s9   ;;  %p825_p10 = scmp.ge.s32.totalorder %s660_s12, 2 }
 0x24e   : > { %s351_s4 = scalar_lea.sflag [#allocation4], %s350_s29 }
 0x24f   : > { %p484_p11 = pnand %p825_p10, %p745_p4 }
 0x251   : > { %p485_p0 = pneg %p484_p11 }
 0x253   : > { %643 = dma.done.wait (%p485_p0), %s351_s4, 64  }
 0x254   : > { %645 = vsyncadd (%p485_p0), %s351_s4, 4294967232  ;;  %p16_p2 = scmp.ge.s32.totalorder %s720_s23, 4   ;;  %s826_s9 = smov %s652_s10 }
 0x255   : > { %s827_s10 = smov %s656_s11  ;;  %s828_s11 = smov %s732_s26 }
 0x256   : > { %s829_s12 = smov %s720_s23  ;;  %18 = sbr.rel (!%p16_p2) target bundleno = 6 (0x6), region = 77 }
 0x25b   :  { %357 = vsyncpa [#allocation3], 1 }
 0x25c   :  { %359 = vsyncpa [#allocation3 + $0x1], 1 }
 0x25d   :  { %360 = vsyncpa [#allocation6], 1 }
 0x25e   :  { %361 = vsyncpa [#allocation4], 1 }
 0x25f   :  { %363 = vsyncpa [#allocation4 + $0x1], 1 }

</bundles_post_ra>
